<compile_context>
chip_gen: v5e
topology: v5e:2x2
jax: 0.10.0
libtpu: 0.0.40
codegen_flags: <defaults>
</compile_context>

<pallas_src>
import functools

import jax
import jax.numpy as jnp
from jax.experimental import pallas as pl
from jax.experimental.pallas import tpu as pltpu


def _round_up(x, m):
    return ((x + m - 1) // m) * m


def critic_kernel(s_ref, a_ref,
                  w1_ref, b1_ref,      # state_h1:  (S, 32) bf16, (1, 32) f32
                  wsa_ref, bsa_ref,    # blockdiag(state_h2, action_h1): (32+A, 128) bf16, (1, 128) f32
                  wm_ref, bm_ref,      # merged_h1: (128, 32) bf16, (1, 32) f32
                  wo_ref, bo_ref,      # output:    (1, 32) f32 row, (1, 1) f32
                  out_ref):            # (TB, 1) f32
    s = s_ref[...]                     # (TB, S) bf16
    a = a_ref[...]                     # (TB, A) bf16

    # state_h1
    h1 = jnp.maximum(
        jnp.dot(s, w1_ref[...], preferred_element_type=jnp.float32)
        + b1_ref[...], 0.0)                                        # (TB, 32) f32

    # [h1 | a] @ blockdiag(W2, Wa) == [h1 @ W2 | a @ Wa]   (state_h2 & action_h1)
    x2 = jnp.concatenate([h1, a.astype(jnp.float32)], axis=-1)     # (TB, 32+A) f32
    h2 = jnp.maximum(
        jnp.dot(x2.astype(jnp.bfloat16), wsa_ref[...],
                preferred_element_type=jnp.float32)
        + bsa_ref[...], 0.0)                                       # (TB, 128) f32

    # merged_h1 over the full 128-lane concatenated activation
    m = jnp.maximum(
        jnp.dot(h2.astype(jnp.bfloat16), wm_ref[...],
                preferred_element_type=jnp.float32)
        + bm_ref[...], 0.0)                                        # (TB, 32) f32

    # output layer: N=1 matmul wastes 127/128 MXU columns -> VPU mul + lane reduce
    out_ref[...] = (jnp.sum(m * wo_ref[...], axis=-1, keepdims=True)
                    + bo_ref[...])                                 # (TB, 1) f32


@functools.partial(jax.jit, static_argnames=("tile_b_max",))
def critic_forward(state, action, params, *, tile_b_max=2048):
    """CriticNet forward: state (B, S) f32, action (B, A) f32 -> (B, 1) f32."""
    (w1, b1, w2, b2, wa, ba, wm, bm, wo, bo) = params
    B, S = state.shape
    A = action.shape[1]

    # Batch tiling: large tiles amortize per-grid-step overhead; pad rows so the
    # grid covers the batch exactly (padded rows are sliced off afterwards).
    tile_b = min(tile_b_max, _round_up(B, 16))
    b_pad = _round_up(B, tile_b)
    if b_pad != B:
        state = jnp.pad(state, ((0, b_pad - B), (0, 0)))
        action = jnp.pad(action, ((0, b_pad - B), (0, 0)))

    # bf16 activations/weights (f32 accumulation in-kernel); f32 biases.
    s_bf = state.astype(jnp.bfloat16)
    a_bf = action.astype(jnp.bfloat16)
    w1_bf = w1.astype(jnp.bfloat16)
    # blockdiag(state_h2 W, action_h1 W): shape (32 + A, 128)
    wsa = jnp.zeros((32 + A, 128), jnp.float32)
    wsa = wsa.at[:32, :64].set(w2).at[32:, 64:].set(wa)
    wsa_bf = wsa.astype(jnp.bfloat16)
    bsa = jnp.concatenate([b2, ba]).reshape(1, 128)
    wm_bf = wm.astype(jnp.bfloat16)

    inputs = (
        s_bf, a_bf,
        w1_bf, b1.reshape(1, -1),
        wsa_bf, bsa,
        wm_bf, bm.reshape(1, -1),
        wo.reshape(1, -1), bo.reshape(1, 1),
    )

    grid = (b_pad // tile_b,)

    def tiled(n):
        return pl.BlockSpec((tile_b, n), lambda i: (i, 0))

    def bcast(shape):
        return pl.BlockSpec(shape, lambda i: (0, 0))

    in_specs = [
        tiled(S), tiled(A),
        bcast(w1_bf.shape), bcast((1, 32)),
        bcast(wsa_bf.shape), bcast((1, 128)),
        bcast(wm_bf.shape), bcast((1, 32)),
        bcast((1, 32)), bcast((1, 1)),
    ]

    flops = 2 * b_pad * (S * 32 + (32 + A) * 128 + 128 * 32 + 32)
    bytes_accessed = (
        b_pad * (S + A) * 2 + b_pad * 1 * 4             # activations in / out
        + (w1_bf.size + wsa_bf.size + wm_bf.size) * 2   # bf16 weights
        + (32 + 128 + 32 + 32 + 1) * 4)                 # f32 biases + output row

    out = pl.pallas_call(
        critic_kernel,
        out_shape=jax.ShapeDtypeStruct((b_pad, 1), jnp.float32),
        grid=grid,
        in_specs=in_specs,
        out_specs=pl.BlockSpec((tile_b, 1), lambda i: (i, 0)),
        compiler_params=pltpu.CompilerParams(
            dimension_semantics=("parallel",)),
        cost_estimate=pl.CostEstimate(
            flops=flops, transcendentals=0, bytes_accessed=bytes_accessed),
    )(*inputs)
    return out[:B]


def init_params(key, state_shape, action_shape):
    """Deterministic PyTorch-style (uniform +-1/sqrt(fan_in)) Linear init.

    Weights are stored as (in_features, out_features), i.e. already transposed
    relative to torch's (out, in) layout.
    """
    def linear(key, fan_in, fan_out):
        kw, kb = jax.random.split(key)
        bound = 1.0 / jnp.sqrt(float(fan_in))
        w = jax.random.uniform(kw, (fan_in, fan_out), jnp.float32, -bound, bound)
        b = jax.random.uniform(kb, (fan_out,), jnp.float32, -bound, bound)
        return w, b

    ks = jax.random.split(key, 5)
    w1, b1 = linear(ks[0], state_shape, 32)   # state_h1
    w2, b2 = linear(ks[1], 32, 64)            # state_h2
    wa, ba = linear(ks[2], action_shape, 64)  # action_h1
    wm, bm = linear(ks[3], 128, 32)           # merged_h1
    wo, bo = linear(ks[4], 32, 1)             # output
    return (w1, b1, w2, b2, wa, ba, wm, bm, wo, bo)


def critic_ref_f32(state, action, params):
    """Pure-f32 reference matching the PyTorch module semantics."""
    (w1, b1, w2, b2, wa, ba, wm, bm, wo, bo) = params
    s = jax.nn.relu(state @ w1 + b1)
    s = jax.nn.relu(s @ w2 + b2)
    a = jax.nn.relu(action @ wa + ba)
    m = jnp.concatenate([s, a], axis=1)
    m = jax.nn.relu(m @ wm + bm)
    return m @ wo + bo


def critic_ref_bf16(state, action, params):
    """Reference mirroring the kernel's bf16-input / f32-accumulate arithmetic."""
    (w1, b1, w2, b2, wa, ba, wm, bm, wo, bo) = params
    bf = jnp.bfloat16
    s = state.astype(bf)
    a = action.astype(bf)
    h1 = jax.nn.relu(jnp.dot(s, w1.astype(bf),
                             preferred_element_type=jnp.float32) + b1)
    x2 = jnp.concatenate([h1, a.astype(jnp.float32)], axis=-1).astype(bf)
    wsa = jnp.zeros((32 + action.shape[1], 128), jnp.float32)
    wsa = wsa.at[:32, :64].set(w2).at[32:, 64:].set(wa)
    bsa = jnp.concatenate([b2, ba])
    h2 = jax.nn.relu(jnp.dot(x2, wsa.astype(bf),
                             preferred_element_type=jnp.float32) + bsa)
    m = jax.nn.relu(jnp.dot(h2.astype(bf), wm.astype(bf),
                            preferred_element_type=jnp.float32) + bm)
    return jnp.sum(m * wo.reshape(1, -1), axis=-1, keepdims=True) + bo


if __name__ == "__main__":
    STATE_SHAPE = 8
    ACTION_SHAPE = 4
    BATCH = 2

    key = jax.random.PRNGKey(0)
    k_params, k_state, k_action = jax.random.split(key, 3)

    params = init_params(k_params, STATE_SHAPE, ACTION_SHAPE)
    state = jax.random.normal(k_state, (BATCH, STATE_SHAPE), jnp.float32)
    action = jax.random.normal(k_action, (BATCH, ACTION_SHAPE), jnp.float32)

    out = jax.block_until_ready(critic_forward(state, action, params))
    assert out.shape == (BATCH, 1)

    # Tight check vs. a reference mirroring the kernel's bf16/f32 arithmetic.
    ref_bf16 = critic_ref_bf16(state, action, params)
    assert jnp.allclose(out, ref_bf16, atol=1e-4, rtol=1e-4), (out, ref_bf16)

    # Loose check vs. the pure-f32 PyTorch-semantics reference (bf16 cast error).
    ref_f32 = critic_ref_f32(state, action, params)
    assert jnp.allclose(out, ref_f32, atol=3e-2, rtol=3e-2), (out, ref_f32)

    print("KERNEL_OK")
</pallas_src>

<mosaic_0001>
module attributes {stable_mosaic.version = 11 : i64} {
  func.func @critic_kernel(%arg0: i32, %arg1: memref<16x8xbf16, #tpu.memory_space<vmem>>, %arg2: memref<16x4xbf16, #tpu.memory_space<vmem>>, %arg3: memref<8x32xbf16, #tpu.memory_space<vmem>>, %arg4: memref<1x32xf32, #tpu.memory_space<vmem>>, %arg5: memref<36x128xbf16, #tpu.memory_space<vmem>>, %arg6: memref<1x128xf32, #tpu.memory_space<vmem>>, %arg7: memref<128x32xbf16, #tpu.memory_space<vmem>>, %arg8: memref<1x32xf32, #tpu.memory_space<vmem>>, %arg9: memref<1x32xf32, #tpu.memory_space<vmem>>, %arg10: memref<1x1xf32, #tpu.memory_space<vmem>>, %arg11: memref<16x1xf32, #tpu.memory_space<vmem>>) attributes {dimension_semantics = [#tpu.dimension_semantics<parallel>], iteration_bounds = array<i64: 1>, scalar_prefetch = 0 : i64, scratch_operands = 0 : i64, tpu.core_type = #tpu.core_type<tc>, window_params = [{transform_indices = @transform_0, window_bounds = array<i64: 16, 8>}, {transform_indices = @transform_1, window_bounds = array<i64: 16, 4>}, {pipeline_mode = #tpu.pipeline_mode<synchronous>, transform_indices = @transform_2, window_bounds = array<i64: 8, 32>}, {pipeline_mode = #tpu.pipeline_mode<synchronous>, transform_indices = @transform_3, window_bounds = array<i64: 1, 32>}, {pipeline_mode = #tpu.pipeline_mode<synchronous>, transform_indices = @transform_4, window_bounds = array<i64: 36, 128>}, {pipeline_mode = #tpu.pipeline_mode<synchronous>, transform_indices = @transform_5, window_bounds = array<i64: 1, 128>}, {pipeline_mode = #tpu.pipeline_mode<synchronous>, transform_indices = @transform_6, window_bounds = array<i64: 128, 32>}, {pipeline_mode = #tpu.pipeline_mode<synchronous>, transform_indices = @transform_7, window_bounds = array<i64: 1, 32>}, {pipeline_mode = #tpu.pipeline_mode<synchronous>, transform_indices = @transform_8, window_bounds = array<i64: 1, 32>}, {pipeline_mode = #tpu.pipeline_mode<synchronous>, transform_indices = @transform_9, window_bounds = array<i64: 1, 1>}, {transform_indices = @transform_10, window_bounds = array<i64: 16, 1>}]} {
    %c0 = arith.constant 0 : index
    %c0_0 = arith.constant 0 : index
    %0 = vector.load %arg1[%c0, %c0_0] : memref<16x8xbf16, #tpu.memory_space<vmem>>, vector<16x8xbf16>
    %c0_1 = arith.constant 0 : index
    %c0_2 = arith.constant 0 : index
    %1 = vector.load %arg2[%c0_1, %c0_2] : memref<16x4xbf16, #tpu.memory_space<vmem>>, vector<16x4xbf16>
    %c0_3 = arith.constant 0 : index
    %c0_4 = arith.constant 0 : index
    %2 = vector.load %arg3[%c0_3, %c0_4] : memref<8x32xbf16, #tpu.memory_space<vmem>>, vector<8x32xbf16>
    %cst = arith.constant dense<0.000000e+00> : vector<16x32xf32>
    %3 = tpu.matmul %0, %2, %cst {dimension_numbers = #tpu.dot_dimension_numbers<[1], [0], [0], [1], [0, 0, 1, 1], [], []>} : vector<16x8xbf16>, vector<8x32xbf16>, vector<16x32xf32> -> vector<16x32xf32>
    %c0_5 = arith.constant 0 : index
    %c0_6 = arith.constant 0 : index
    %4 = vector.load %arg4[%c0_5, %c0_6] : memref<1x32xf32, #tpu.memory_space<vmem>>, vector<1x32xf32>
    %5 = vector.broadcast %4 : vector<1x32xf32> to vector<16x32xf32>
    %6 = arith.addf %3, %5 : vector<16x32xf32>
    %cst_7 = arith.constant 0.000000e+00 : f32
    %7 = vector.broadcast %cst_7 : f32 to vector<16x32xf32>
    %8 = arith.maximumf %6, %7 : vector<16x32xf32>
    %9 = arith.extf %1 : vector<16x4xbf16> to vector<16x4xf32>
    %10 = tpu.concatenate %8, %9 in 1 : vector<16x32xf32>, vector<16x4xf32> -> vector<16x36xf32>
    %11 = arith.truncf %10 : vector<16x36xf32> to vector<16x36xbf16>
    %c0_8 = arith.constant 0 : index
    %c0_9 = arith.constant 0 : index
    %12 = vector.load %arg5[%c0_8, %c0_9] : memref<36x128xbf16, #tpu.memory_space<vmem>>, vector<36x128xbf16>
    %cst_10 = arith.constant dense<0.000000e+00> : vector<16x128xf32>
    %13 = tpu.matmul %11, %12, %cst_10 {dimension_numbers = #tpu.dot_dimension_numbers<[1], [0], [0], [1], [0, 0, 1, 1], [], []>} : vector<16x36xbf16>, vector<36x128xbf16>, vector<16x128xf32> -> vector<16x128xf32>
    %c0_11 = arith.constant 0 : index
    %c0_12 = arith.constant 0 : index
    %14 = vector.load %arg6[%c0_11, %c0_12] : memref<1x128xf32, #tpu.memory_space<vmem>>, vector<1x128xf32>
    %15 = vector.broadcast %14 : vector<1x128xf32> to vector<16x128xf32>
    %16 = arith.addf %13, %15 : vector<16x128xf32>
    %cst_13 = arith.constant 0.000000e+00 : f32
    %17 = vector.broadcast %cst_13 : f32 to vector<16x128xf32>
    %18 = arith.maximumf %16, %17 : vector<16x128xf32>
    %19 = arith.truncf %18 : vector<16x128xf32> to vector<16x128xbf16>
    %c0_14 = arith.constant 0 : index
    %c0_15 = arith.constant 0 : index
    %20 = vector.load %arg7[%c0_14, %c0_15] : memref<128x32xbf16, #tpu.memory_space<vmem>>, vector<128x32xbf16>
    %cst_16 = arith.constant dense<0.000000e+00> : vector<16x32xf32>
    %21 = tpu.matmul %19, %20, %cst_16 {dimension_numbers = #tpu.dot_dimension_numbers<[1], [0], [0], [1], [0, 0, 1, 1], [], []>} : vector<16x128xbf16>, vector<128x32xbf16>, vector<16x32xf32> -> vector<16x32xf32>
    %c0_17 = arith.constant 0 : index
    %c0_18 = arith.constant 0 : index
    %22 = vector.load %arg8[%c0_17, %c0_18] : memref<1x32xf32, #tpu.memory_space<vmem>>, vector<1x32xf32>
    %23 = vector.broadcast %22 : vector<1x32xf32> to vector<16x32xf32>
    %24 = arith.addf %21, %23 : vector<16x32xf32>
    %cst_19 = arith.constant 0.000000e+00 : f32
    %25 = vector.broadcast %cst_19 : f32 to vector<16x32xf32>
    %26 = arith.maximumf %24, %25 : vector<16x32xf32>
    %c0_20 = arith.constant 0 : index
    %c0_21 = arith.constant 0 : index
    %27 = vector.load %arg9[%c0_20, %c0_21] : memref<1x32xf32, #tpu.memory_space<vmem>>, vector<1x32xf32>
    %28 = vector.broadcast %27 : vector<1x32xf32> to vector<16x32xf32>
    %29 = arith.mulf %26, %28 : vector<16x32xf32>
    %cst_22 = arith.constant dense<0.000000e+00> : vector<16xf32>
    %30 = vector.multi_reduction <add>, %29, %cst_22 [1] : vector<16x32xf32> to vector<16xf32>
    %31 = vector.shape_cast %30 : vector<16xf32> to vector<16x1xf32>
    %c0_23 = arith.constant 0 : index
    %c0_24 = arith.constant 0 : index
    %32 = vector.load %arg10[%c0_23, %c0_24] : memref<1x1xf32, #tpu.memory_space<vmem>>, vector<1x1xf32>
    %33 = vector.broadcast %32 : vector<1x1xf32> to vector<16x1xf32>
    %34 = arith.addf %31, %33 : vector<16x1xf32>
    %c0_25 = arith.constant 0 : index
    %c0_26 = arith.constant 0 : index
    %35 = vector.load %arg11[%c0_25, %c0_26] : memref<16x1xf32, #tpu.memory_space<vmem>>, vector<16x1xf32>
    tpu.vector_store %arg11[%c0_25, %c0_26], %34 {strides = array<i32>} : memref<16x1xf32, #tpu.memory_space<vmem>>, vector<16x1xf32>,
    return
  }
  func.func @transform_0(%arg0: i32) -> (i32, i32) {
    %c0_i32 = arith.constant 0 : i32
    %c0_i32_0 = arith.constant 0 : i32
    return %arg0, %c0_i32 : i32, i32
  }
  func.func @transform_1(%arg0: i32) -> (i32, i32) {
    %c0_i32 = arith.constant 0 : i32
    %c0_i32_0 = arith.constant 0 : i32
    return %arg0, %c0_i32 : i32, i32
  }
  func.func @transform_2(%arg0: i32) -> (i32, i32) {
    %c0_i32 = arith.constant 0 : i32
    %c0_i32_0 = arith.constant 0 : i32
    %c0_i32_1 = arith.constant 0 : i32
    return %c0_i32, %c0_i32_0 : i32, i32
  }
  func.func @transform_3(%arg0: i32) -> (i32, i32) {
    %c0_i32 = arith.constant 0 : i32
    %c0_i32_0 = arith.constant 0 : i32
    %c0_i32_1 = arith.constant 0 : i32
    return %c0_i32, %c0_i32_0 : i32, i32
  }
  func.func @transform_4(%arg0: i32) -> (i32, i32) {
    %c0_i32 = arith.constant 0 : i32
    %c0_i32_0 = arith.constant 0 : i32
    %c0_i32_1 = arith.constant 0 : i32
    return %c0_i32, %c0_i32_0 : i32, i32
  }
  func.func @transform_5(%arg0: i32) -> (i32, i32) {
    %c0_i32 = arith.constant 0 : i32
    %c0_i32_0 = arith.constant 0 : i32
    %c0_i32_1 = arith.constant 0 : i32
    return %c0_i32, %c0_i32_0 : i32, i32
  }
  func.func @transform_6(%arg0: i32) -> (i32, i32) {
    %c0_i32 = arith.constant 0 : i32
    %c0_i32_0 = arith.constant 0 : i32
    %c0_i32_1 = arith.constant 0 : i32
    return %c0_i32, %c0_i32_0 : i32, i32
  }
  func.func @transform_7(%arg0: i32) -> (i32, i32) {
    %c0_i32 = arith.constant 0 : i32
    %c0_i32_0 = arith.constant 0 : i32
    %c0_i32_1 = arith.constant 0 : i32
    return %c0_i32, %c0_i32_0 : i32, i32
  }
  func.func @transform_8(%arg0: i32) -> (i32, i32) {
    %c0_i32 = arith.constant 0 : i32
    %c0_i32_0 = arith.constant 0 : i32
    %c0_i32_1 = arith.constant 0 : i32
    return %c0_i32, %c0_i32_0 : i32, i32
  }
  func.func @transform_9(%arg0: i32) -> (i32, i32) {
    %c0_i32 = arith.constant 0 : i32
    %c0_i32_0 = arith.constant 0 : i32
    %c0_i32_1 = arith.constant 0 : i32
    return %c0_i32, %c0_i32_0 : i32, i32
  }
  func.func @transform_10(%arg0: i32) -> (i32, i32) {
    %c0_i32 = arith.constant 0 : i32
    %c0_i32_0 = arith.constant 0 : i32
    return %arg0, %c0_i32 : i32, i32
  }
}

</mosaic_0001>

<bundles_post_ra>
// kernel: critic_forward.1
= control target key start
LH: loop header
LB: loop body
LE: loop exit
PB: predicated region body
PF: predicated region fallthrough
CT: control target
= control target key end

     0   :  { %vm56_vm0 = vcmask 1043456   ;;  %vm52_vm1 = vcmask 64512   ;;  %s320_s19 = smov 32   ;;  %vm118_vm2 = vcmask 1041408   ;;  %vm86_vm3 = vcmask 261120   ;;  %s443_s2 = inlined_call_operand.vmem [shape: bf16[8,32], index: 2, kind: input, shape index: {}]   ;;  %s444_s0 = inlined_call_operand.vmem [shape: bf16[16,8], index: 0, kind: input, shape index: {}]   ;;  %s445_s1 = inlined_call_operand.vmem [shape: bf16[16,4], index: 1, kind: input, shape index: {}]   ;;  %s446_s3 = inlined_call_operand.vmem [shape: f32[1,32], index: 3, kind: input, shape index: {}]   ;;  %s447_s5 = inlined_call_operand.vmem [shape: f32[1,128], index: 5, kind: input, shape index: {}]   ;;  %s448_s4 = inlined_call_operand.vmem [shape: bf16[36,128], index: 4, kind: input, shape index: {}]   ;;  %s449_s6 = inlined_call_operand.vmem [shape: bf16[128,32], index: 6, kind: input, shape index: {}]   ;;  %s450_s7 = inlined_call_operand.vmem [shape: f32[1,32], index: 7, kind: input, shape index: {}]   ;;  %s451_s8 = inlined_call_operand.vmem [shape: f32[1,32], index: 8, kind: input, shape index: {}]   ;;  %s452_s9 = inlined_call_operand.<no memory space> [shape: f32[1,1], index: 9, kind: input, shape index: {}]   ;;  %s453_s10 = inlined_call_operand.vmem [shape: f32[16,1], index: 10, kind: output, shape index: {}]  }
   0x1   :  { %v42_v0 = vld [vmem:[%s443_s2] sm:$0xf]  ;;  %v94_v7 = vld [vmem:[%s448_s4 + $0x10] sm:$0x3]  ;;  %v296_v11 = vld [vmem:[%s448_s4 + $0x8] sm:$0xff]  ;;  %vm114_vm4 = vcmask 293888   ;;  %v15_v42 = vstv %s452_s9 }
   0x2   :  { %v306_v1 = vld [vmem:[%s445_s1] sm:$0xff]   ;;  %v58_v2 = vsel %vm56_vm0, %v42_v0, 0  ;;  %v108_v8 = vunpack.c.l.b16 %v94_v7  ;;  %v304_v13 = vld [vmem:[%s449_s6 + $0x38] sm:$0xff]  ;;  %v303_v14 = vld [vmem:[%s449_s6 + $0x30] sm:$0xff]  ;;  %16 = vst [vmem:[#allocation2] sm:$0x1] %v15_v42 }
   0x3   :  { %v294_v3 = vld [vmem:[%s444_s0] sm:$0xff]  ;;  %v307_v4 = vunpack.c.l.bf16 %v306_v1  ;;  %v308_v5 = vunpack.c.h.bf16 %v306_v1  ;;  %67 = vmatpush.bf16.msra.mxu0 %v58_v2  ;;  %207 = vmatpush.bf16.msra.mxu2 %v304_v13  ;;  %v302_v15 = vld [vmem:[%s449_s6 + $0x28] sm:$0xff]  ;;  %v300_v30 = vld [vmem:[%s449_s6 + $0x18] sm:$0xff]  ;;  %vm241_vm5 = vcmask 7168  }
   0x4   :  { %v111_v9 = vpack.c.b16 %v108_v8, %v108_v8  ;;  %v295_v12 = vld [vmem:[%s448_s4] sm:$0xff]  ;;  %v299_v31 = vld [vmem:[%s449_s6 + $0x10] sm:$0xff]  ;;  %v298_v32 = vld [vmem:[%s449_s6 + $0x8] sm:$0xff] }
   0x5   :  { %v310_v6 = vpack.i.bf16 %v308_v5, %v307_v4  ;;  %v301_v16 = vld [vmem:[%s449_s6 + $0x20] sm:$0xff] }
   0x6   :  { %252 = vmatmul.msk.bf16.vlgmr.msra.gmra.mxu0 %vm52_vm1, %v294_v3  ;;  %v120_v10 = vsel %vm118_vm2, %v111_v9, 0  ;;  %v315_v18 = vld [vmem:[%s446_s3] ss:$0 sm:$0xff] }
   0x7   :  { %311 = vrot.lane.b32.xlu0 %v310_v6, %s320_s19  ;;  %127 = vmatpush.bf16.msra.mxu1 %v120_v10  ;;  %v297_v33 = vld [vmem:[%s449_s6] sm:$0xff] }
   0x8   :  { %208 = vmatpush.bf16.msra.mxu2 %v303_v14  ;;  %v316_v35 = vld [vmem:[%s447_s5] ss:$0 sm:$0xff] }
   0x9   :  { %v317_v43 = vld [vmem:[%s450_s7] ss:$0 sm:$0xff] }
   0xa   :  { %v318_v46 = vld [vmem:[%s451_s8] ss:$0 sm:$0xff] }
   0xb   :  { %128 = vmatpush.bf16.msra.mxu1 %v296_v11  ;;  %v319_v55 = vld [vmem:[#allocation2] ss:$0 sm:$0xff] }
   0xc   :  { %209 = vmatpush.bf16.msra.mxu2 %v302_v15 }
   0xf   :  { %129 = vmatpush.bf16.msra.mxu1 %v295_v12 }
  0x10   :  { %210 = vmatpush.bf16.msra.mxu2 %v301_v16 }
  0x14   :  { %211 = vmatpush.bf16.msra.mxu2 %v300_v30 }
  0x18   :  { %212 = vmatpush.bf16.msra.mxu2 %v299_v31 }
  0x1c   :  { %213 = vmatpush.bf16.msra.mxu2 %v298_v32 }
  0x20   :  { %214 = vmatpush.bf16.msra.mxu2 %v297_v33 }
  0x79   :  { %v312_v20 = vpop.permute.xlu0 %311 }
  0x7a   :  { %v314_v23 = vunpack.i.h.bf16 %v312_v20  ;;  %v313_v24 = vunpack.i.l.bf16 %v312_v20 }
  0x83   :  { %v69_v17 = vpop.f32.mrf.mxu0 }
  0x84   :  { %v70_v19 = vadd.f32 %v315_v18, %v69_v17 }
  0x86   :  { %v74_v22 = vmax.f32 %v70_v19, 0.0 }
  0x88   :  { %v87_v27 = vsel %vm86_vm3, %v74_v22, %v313_v24 }
  0x8b   :  { %v71_v21 = vpop.f32.mrf.mxu0 }
  0x8c   :  { %v72_v25 = vadd.f32 %v315_v18, %v71_v21 }
  0x8e   :  { %v75_v26 = vmax.f32 %v72_v25, 0.0 }
  0x90   :  { %v88_v28 = vsel %vm86_vm3, %v75_v26, %v314_v23 }
  0x91   :  { %v89_v29 = vpack.c.bf16 %v88_v28, %v87_v27 }
  0x93   :  { %261 = vmatmul.msk.bf16.vlgmr.msra.gmra.mxu1 %vm114_vm4, %v89_v29 }
 0x110   :  { %v131_v34 = vpop.f32.mrf.mxu1 }
 0x111   :  { %v132_v36 = vadd.f32 %v316_v35, %v131_v34 }
 0x113   :  { %v136_v39 = vmax.f32 %v132_v36, 0.0 }
 0x118   :  { %v133_v37 = vpop.f32.mrf.mxu1 }
 0x119   :  { %v134_v38 = vadd.f32 %v316_v35, %v133_v37 }
 0x11b   :  { %v137_v40 = vmax.f32 %v134_v38, 0.0 }
 0x11d   :  { %v138_v41 = vpack.c.bf16 %v137_v40, %v136_v39 }
 0x11f   :  { %215 = vmatmul.bf16.vlgmr.msra.gmra.mxu2 %v138_v41 }
 0x1a2   :  { %v216_v44 = vpop.f32.mrf.mxu2 }
 0x1a3   :  { %v217_v45 = vadd.f32 %v317_v43, %v216_v44 }
 0x1a5   :  { %v221_v47 = vmax.f32 %v217_v45, 0.0 }
 0x1a7   :  { %v227_v48 = vmul.f32 %v318_v46, %v221_v47 }
 0x1a9   :  { %v229_v49 = vsel %vm86_vm3, %v227_v48, 0.0 }
 0x1aa   :  { %v218_v50 = vpop.f32.mrf.mxu2  ;;  %230 = vadd.xlane.f32.xlu0 %v229_v49 }
 0x1ab   :  { %v219_v51 = vadd.f32 %v317_v43, %v218_v50 }
 0x1ad   :  { %v222_v52 = vmax.f32 %v219_v51, 0.0 }
 0x1af   :  { %v228_v53 = vmul.f32 %v318_v46, %v222_v52 }
 0x1b1   :  { %v232_v54 = vsel %vm86_vm3, %v228_v53, 0.0 }
 0x1b2   :  { %233 = vadd.xlane.f32.xlu1 %v232_v54 }
 0x21d   :  { %v231_v56 = vpop.xlane.xlu0 %230 }
 0x21e   :  { %v239_v57 = vadd.f32 %v319_v55, %v231_v56 }
 0x220   :  { %242 = vst.msk [vmem:[%s453_s10] sm:$0xff] %vm241_vm5, %v239_v57 }
 0x225   :  { %v234_v58 = vpop.xlane.xlu1 %233 }
 0x226   :  { %v240_v59 = vadd.f32 %v319_v55, %v234_v58 }
 0x228   :  { %243 = vst.msk [vmem:[%s453_s10 + $0x8] sm:$0xff] %vm241_vm5, %v240_v59 }

</bundles_post_ra>
